<compile_context>
chip_gen: v6e
topology: v6e:2x2x1
jax: 0.10.0
libtpu: 0.0.40
codegen_flags: <defaults>
</compile_context>

<pallas_src>
import numpy as np
import jax
import jax.numpy as jnp
from jax import lax
from jax.experimental import pallas as pl
from jax.experimental.pallas import tpu as pltpu

LANE = 128  # pad vertex count to a multiple of the lane width


# -----------------------------------------------------------------------------
# Pallas kernel: per-frame masked affine over all vertices
#   gp  = [Rf (9, row-major) | offf (3)]            : non-part vertices
#   fp  = per frame [Ma (9, row-major) | ca (3)]    : articulated-part vertices
# Both already include objR, the xyz offset and the y/z flip.
# -----------------------------------------------------------------------------
def _vertex_transform_kernel(seg_ref, gp_ref, fp_ref, verts_ref, out_ref):
    # seg_ref  : (2,)   int32 SMEM  [vertexStart, vertexEnd)
    # gp_ref   : (12,)  f32   SMEM
    # fp_ref   : (N*12,) f32  SMEM
    # verts_ref: (3, Vp) f32 VMEM  (whole mesh, resident across frames)
    # out_ref  : (3, Vp) f32 VMEM  (frame dim squeezed)
    f = pl.program_id(0)
    base = f * 12

    v = verts_ref[...]                       # (3, Vp)
    v0 = v[0:1, :]
    v1 = v[1:2, :]
    v2 = v[2:3, :]

    # segment mask over lanes (block covers the whole mesh -> lane idx == vertex idx)
    gidx = lax.broadcasted_iota(jnp.int32, (1, v.shape[1]), 1)
    m = (gidx >= seg_ref[0]) & (gidx < seg_ref[1])

    for r in range(3):
        # background (non-part) affine coefficients — frame independent
        g0 = gp_ref[3 * r + 0]
        g1 = gp_ref[3 * r + 1]
        g2 = gp_ref[3 * r + 2]
        gb = gp_ref[9 + r]
        # articulated-part affine coefficients — per frame
        a0 = fp_ref[base + 3 * r + 0]
        a1 = fp_ref[base + 3 * r + 1]
        a2 = fp_ref[base + 3 * r + 2]
        ab = fp_ref[base + 9 + r]

        o_bg = g0 * v0 + g1 * v1 + g2 * v2 + gb
        o_pt = a0 * v0 + a1 * v1 + a2 * v2 + ab
        out_ref[r:r + 1, :] = jnp.where(m, o_pt, o_bg)


def transform_all_frames(verts_3xVp, seg, gparams, fparams, nframes):
    """verts_3xVp: (3, Vp) f32 (Vp multiple of 128). Returns (nframes, 3, Vp)."""
    Vp = verts_3xVp.shape[1]
    return pl.pallas_call(
        _vertex_transform_kernel,
        out_shape=jax.ShapeDtypeStruct((nframes, 3, Vp), jnp.float32),
        grid=(nframes,),
        in_specs=[
            pl.BlockSpec(memory_space=pltpu.MemorySpace.SMEM),  # seg (2,) i32
            pl.BlockSpec(memory_space=pltpu.MemorySpace.SMEM),  # gparams (12,)
            pl.BlockSpec(memory_space=pltpu.MemorySpace.SMEM),  # fparams (N*12,)
            pl.BlockSpec((3, Vp), lambda f: (0, 0)),            # whole mesh, resident
        ],
        out_specs=pl.BlockSpec((None, 3, Vp), lambda f: (f, 0, 0)),
        compiler_params=pltpu.CompilerParams(
            dimension_semantics=("parallel",)),                 # frames -> 2 TCs on v7x
    )(seg.astype(jnp.int32),
      gparams.astype(jnp.float32),
      fparams.astype(jnp.float32),
      verts_3xVp.astype(jnp.float32))


# -----------------------------------------------------------------------------
# Glue math (tiny 3x3 matrices) — mirrors pytorch3d / d3dhoi helpers
# -----------------------------------------------------------------------------
def euler_angles_to_matrix_np(pitch, yaw, roll):
    """pytorch3d euler_angles_to_matrix([pitch, yaw, roll], ['X','Y','Z'])."""
    def RX(t):
        c, s = np.cos(t), np.sin(t)
        return np.array([[1, 0, 0], [0, c, -s], [0, s, c]], np.float32)

    def RY(t):
        c, s = np.cos(t), np.sin(t)
        return np.array([[c, 0, s], [0, 1, 0], [-s, 0, c]], np.float32)

    def RZ(t):
        c, s = np.cos(t), np.sin(t)
        return np.array([[c, -s, 0], [s, c, 0], [0, 0, 1]], np.float32)

    return (RX(pitch) @ RY(yaw) @ RZ(roll)).astype(np.float32)


def rotation_matrix(axis, theta):
    """Euler-Rodrigues rotation matrix (matches d3dhoi rotation_matrix)."""
    axis = axis / jnp.sqrt(jnp.dot(axis, axis))
    a = jnp.cos(theta / 2.0)
    b, c, d = -axis * jnp.sin(theta / 2.0)
    aa, bb, cc, dd = a * a, b * b, c * c, d * d
    bc, ad, ac, ab, bd, cd = b * c, a * d, a * c, a * b, b * d, c * d
    return jnp.stack([
        jnp.stack([aa + bb - cc - dd, 2 * (bc + ad), 2 * (bd - ac)]),
        jnp.stack([2 * (bc - ad), aa + cc - bb - dd, 2 * (cd + ab)]),
        jnp.stack([2 * (bd + ac), 2 * (cd - ab), aa + dd - bb - cc]),
    ]).astype(jnp.float32)


# -----------------------------------------------------------------------------
# JOHMRLite (JAX/Pallas version)
# -----------------------------------------------------------------------------
class JOHMRLiteJax:
    def __init__(self, x_offset, y_offset, z_offset, yaw, pitch, roll,
                 part_motion, obj_size, obj_verts, obj_faces, part_idx,
                 rot_o, axis, vertexSegs, faceSegs, rot_type):
        obj_verts = np.asarray(obj_verts, np.float32).copy()
        self.obj_faces = jnp.asarray(np.asarray(obj_faces))
        self.rot_type = rot_type
        self.x_offset = float(x_offset)
        self.y_offset = float(y_offset)
        self.z_offset = float(z_offset)
        self.part_motion = np.asarray(part_motion, np.float32)

        # TODO(synk): look_at_view_transform produces self.R / self.T which are
        # unused in forward(); camera R/T not materialized.

        obj_size = [x / 100.0 for x in obj_size]
        x_diff = obj_verts[:, 0].max() - obj_verts[:, 0].min()
        y_diff = obj_verts[:, 1].max() - obj_verts[:, 1].min()
        z_diff = obj_verts[:, 2].max() - obj_verts[:, 2].min()
        self.x_ratio = float(obj_size[0]) / float(x_diff)
        self.y_ratio = float(obj_size[1]) / float(y_diff)
        self.z_ratio = float(obj_size[2]) / float(z_diff)

        self.vertexStart = int(vertexSegs[part_idx])
        self.vertexEnd = int(vertexSegs[part_idx + 1])
        self.faceStart = int(faceSegs[part_idx])
        self.faceEnd = int(faceSegs[part_idx + 1])

        rot_o_np = np.asarray(rot_o[part_idx], np.float32).copy()
        ax_np = np.asarray(axis[part_idx], np.float32).copy()
        rot_o_np[1:] *= -1.0
        ax_np[1:] *= -1.0

        obj_verts[:, 0] *= self.x_ratio
        obj_verts[:, 1] *= self.y_ratio
        obj_verts[:, 2] *= self.z_ratio
        rot_o_np[0] *= self.x_ratio
        rot_o_np[1] *= self.y_ratio
        rot_o_np[2] *= self.z_ratio

        self.obj_verts = jnp.asarray(obj_verts)               # (V, 3) torch layout
        self.rot_o = jnp.asarray(rot_o_np)
        self.axis = jnp.asarray(ax_np)
        self.objR = jnp.asarray(euler_angles_to_matrix_np(pitch, yaw, roll))

        # ---- hoisted: lane-dense padded (3, Vp) layout, built once ----------
        self._V = obj_verts.shape[0]
        self._Vp = ((self._V + LANE - 1) // LANE) * LANE
        self._verts_padded = (
            jnp.zeros((3, self._Vp), jnp.float32)
            .at[:, :self._V].set(jnp.asarray(obj_verts.T, jnp.float32)))

        self._all_obj_verts = None   # lazy cache of all frames, (N, V, 3)

    # --- build composed per-frame affines and run ONE pallas_call -----------
    def _precompute_all_frames(self):
        N = self.part_motion.shape[0]
        pm = jnp.asarray(self.part_motion, jnp.float32)

        if self.rot_type[0] == 'prismatic':
            A = jnp.broadcast_to(jnp.eye(3, dtype=jnp.float32), (N, 3, 3))
            b = pm[:, None] * self.axis[None, :]                       # (N, 3)
        else:  # revolute
            thetas = pm * 0.0174533
            A = jax.vmap(lambda t: rotation_matrix(self.axis, t))(thetas)  # (N,3,3)
            b = self.rot_o[None, :] - jnp.einsum('nij,j->ni', A, self.rot_o)

        # fold global rotation, xyz offset and the y/z flip into the constants
        flip = jnp.array([1.0, -1.0, -1.0], jnp.float32)
        Rf = flip[:, None] * self.objR                                  # Flip @ objR
        off = jnp.array([self.x_offset, self.y_offset, self.z_offset], jnp.float32)
        offf = flip * off

        Ma = jnp.einsum('ij,njk->nik', Rf, A)                           # (N, 3, 3)
        ca = jnp.einsum('ij,nj->ni', Rf, b) + offf[None, :]             # (N, 3)

        gparams = jnp.concatenate([Rf.reshape(-1), offf])               # (12,)
        fparams = jnp.concatenate(
            [Ma.reshape(N, 9), ca], axis=1).reshape(-1)                 # (N*12,)
        seg = jnp.array([self.vertexStart, self.vertexEnd], jnp.int32)

        out = transform_all_frames(self._verts_padded, seg, gparams, fparams, N)
        # single layout fix-up at the API boundary, for all frames at once
        self._all_obj_verts = jnp.transpose(out[:, :, :self._V], (0, 2, 1))  # (N,V,3)

    def forward(self, index):
        if self._all_obj_verts is None:
            self._precompute_all_frames()
        obj_verts = self._all_obj_verts[index]                          # (V, 3)

        off = jnp.array([self.x_offset, self.y_offset, self.z_offset], jnp.float32)
        _rot_o = (self.objR @ self.rot_o)[None, :] + off[None, :]
        _axis = (self.objR @ self.axis)[None, :]

        part_verts = obj_verts[self.vertexStart:self.vertexEnd]
        part_faces = self.obj_faces[self.faceStart:self.faceEnd]
        return obj_verts, self.obj_faces, part_verts, part_faces, _rot_o, _axis


# -----------------------------------------------------------------------------
# Pure-numpy reference of forward() for correctness checking
# -----------------------------------------------------------------------------
def reference_forward(model, index):
    v = np.asarray(model.obj_verts).copy()
    rot_o = np.asarray(model.rot_o)
    ax = np.asarray(model.axis)
    R = np.asarray(model.objR)
    pm = float(model.part_motion[index])
    s, e = model.vertexStart, model.vertexEnd
    if model.rot_type[0] == 'prismatic':
        v[s:e] = (v[s:e] - rot_o) + ax * pm + rot_o
    else:
        theta = pm * 0.0174533
        Rp = np.asarray(rotation_matrix(jnp.asarray(ax), jnp.float32(theta)))
        v[s:e] = (Rp @ (v[s:e] - rot_o).T).T + rot_o
    v = (R @ v.T).T
    v[:, 0] += model.x_offset
    v[:, 1] += model.y_offset
    v[:, 2] += model.z_offset
    v[:, 1:] *= -1.0
    return v


if __name__ == "__main__":
    key = jax.random.PRNGKey(0)
    k1, k2 = jax.random.split(key, 2)

    V, F, NFRAMES = 512, 300, 8
    obj_verts = jax.random.uniform(k1, (V, 3), jnp.float32, -1.0, 1.0)
    obj_faces = jax.random.randint(k2, (F, 3), 0, V, jnp.int32)

    part_motion = np.linspace(-30.0, 30.0, NFRAMES).astype(np.float32)  # degrees
    obj_size = [80.0, 60.0, 45.0]                                       # cm
    vertexSegs = [0, 256, V]
    faceSegs = [0, 150, F]
    part_idx = 0
    rot_o = [np.array([0.10, 0.20, -0.15], np.float32),
             np.array([0.00, 0.00, 0.00], np.float32)]
    axis_list = [np.array([0.0, 1.0, 0.0], np.float32),
                 np.array([1.0, 0.0, 0.0], np.float32)]

    # ---- revolute model ------------------------------------------------------
    model = JOHMRLiteJax(
        x_offset=0.05, y_offset=-0.10, z_offset=1.50,
        yaw=0.30, pitch=0.10, roll=-0.20,
        part_motion=part_motion, obj_size=obj_size,
        obj_verts=np.asarray(obj_verts), obj_faces=obj_faces,
        part_idx=part_idx, rot_o=rot_o, axis=axis_list,
        vertexSegs=vertexSegs, faceSegs=faceSegs,
        rot_type=['revolute', 'revolute'])

    outs = model.forward(3)
    obj_v, obj_f, part_v, part_f, out_rot_o, out_axis = [
        jax.block_until_ready(o) for o in outs]

    ref = reference_forward(model, 3)
    assert obj_v.shape == (V, 3) and part_v.shape == (256, 3)
    assert obj_f.shape == (F, 3) and part_f.shape == (150, 3)
    assert out_rot_o.shape == (1, 3) and out_axis.shape == (1, 3)
    assert np.allclose(np.asarray(obj_v), ref, rtol=1e-4, atol=1e-4)
    assert np.allclose(np.asarray(part_v), ref[0:256], rtol=1e-4, atol=1e-4)

    # a second frame (cached batched result, no new kernel launch)
    obj_v6 = jax.block_until_ready(model.forward(6)[0])
    ref6 = reference_forward(model, 6)
    assert np.allclose(np.asarray(obj_v6), ref6, rtol=1e-4, atol=1e-4)

    # ---- prismatic model -----------------------------------------------------
    pris_motion = np.linspace(-0.05, 0.05, NFRAMES).astype(np.float32)  # meters
    model_p = JOHMRLiteJax(
        x_offset=-0.02, y_offset=0.07, z_offset=1.20,
        yaw=-0.15, pitch=0.25, roll=0.05,
        part_motion=pris_motion, obj_size=obj_size,
        obj_verts=np.asarray(obj_verts), obj_faces=obj_faces,
        part_idx=part_idx, rot_o=rot_o, axis=axis_list,
        vertexSegs=vertexSegs, faceSegs=faceSegs,
        rot_type=['prismatic', 'prismatic'])

    obj_vp = jax.block_until_ready(model_p.forward(5)[0])
    refp = reference_forward(model_p, 5)
    assert np.allclose(np.asarray(obj_vp), refp, rtol=1e-4, atol=1e-4)

    print("KERNEL_OK")
</pallas_src>

<mosaic_0001>
module attributes {stable_mosaic.version = 11 : i64} {
  func.func @_vertex_transform_kernel(%arg0: i32, %arg1: memref<2xi32, #tpu.memory_space<smem>>, %arg2: memref<12xf32, #tpu.memory_space<smem>>, %arg3: memref<96xf32, #tpu.memory_space<smem>>, %arg4: memref<3x512xf32, #tpu.memory_space<vmem>>, %arg5: memref<1x3x512xf32, #tpu.memory_space<vmem>>) attributes {dimension_semantics = [#tpu.dimension_semantics<parallel>], iteration_bounds = array<i64: 8>, scalar_prefetch = 0 : i64, scratch_operands = 0 : i64, tpu.core_type = #tpu.core_type<tc>, window_params = [{transform_indices = @transform_0, window_bounds = array<i64: 2>}, {transform_indices = @transform_1, window_bounds = array<i64: 12>}, {transform_indices = @transform_2, window_bounds = array<i64: 96>}, {pipeline_mode = #tpu.pipeline_mode<synchronous>, transform_indices = @transform_3, window_bounds = array<i64: 3, 512>}, {transform_indices = @transform_4, window_bounds = array<i64: 1, 3, 512>}]} {
    %c12_i32 = arith.constant 12 : i32
    %0 = arith.muli %arg0, %c12_i32 : i32
    %c0 = arith.constant 0 : index
    %c0_0 = arith.constant 0 : index
    %1 = vector.load %arg4[%c0, %c0_0] : memref<3x512xf32, #tpu.memory_space<vmem>>, vector<3x512xf32>
    %2 = vector.extract_strided_slice %1 {offsets = [0, 0], sizes = [1, 512], strides = [1, 1]} : vector<3x512xf32> to vector<1x512xf32>
    %3 = vector.extract_strided_slice %1 {offsets = [1, 0], sizes = [1, 512], strides = [1, 1]} : vector<3x512xf32> to vector<1x512xf32>
    %4 = vector.extract_strided_slice %1 {offsets = [2, 0], sizes = [1, 512], strides = [1, 1]} : vector<3x512xf32> to vector<1x512xf32>
    %5 = tpu.iota {dimensions = array<i32: 1>} : vector<1x512xi32>
    %c0_1 = arith.constant 0 : index
    %6 = memref.load %arg1[%c0_1] : memref<2xi32, #tpu.memory_space<smem>>
    %7 = vector.broadcast %6 : i32 to vector<1x512xi32>
    %8 = arith.cmpi sge, %5, %7 : vector<1x512xi32>
    %c1 = arith.constant 1 : index
    %9 = memref.load %arg1[%c1] : memref<2xi32, #tpu.memory_space<smem>>
    %10 = vector.broadcast %9 : i32 to vector<1x512xi32>
    %11 = arith.cmpi slt, %5, %10 : vector<1x512xi32>
    %12 = arith.andi %8, %11 : vector<1x512xi1>
    %c0_2 = arith.constant 0 : index
    %13 = memref.load %arg2[%c0_2] : memref<12xf32, #tpu.memory_space<smem>>
    %c1_3 = arith.constant 1 : index
    %14 = memref.load %arg2[%c1_3] : memref<12xf32, #tpu.memory_space<smem>>
    %c2 = arith.constant 2 : index
    %15 = memref.load %arg2[%c2] : memref<12xf32, #tpu.memory_space<smem>>
    %c9 = arith.constant 9 : index
    %16 = memref.load %arg2[%c9] : memref<12xf32, #tpu.memory_space<smem>>
    %c0_i32 = arith.constant 0 : i32
    %17 = arith.addi %0, %c0_i32 : i32
    %c0_i32_4 = arith.constant 0 : i32
    %18 = arith.addi %17, %c0_i32_4 : i32
    %19 = arith.index_cast %18 : i32 to index
    %20 = memref.load %arg3[%19] : memref<96xf32, #tpu.memory_space<smem>>
    %c0_i32_5 = arith.constant 0 : i32
    %21 = arith.addi %0, %c0_i32_5 : i32
    %c1_i32 = arith.constant 1 : i32
    %22 = arith.addi %21, %c1_i32 : i32
    %23 = arith.index_cast %22 : i32 to index
    %24 = memref.load %arg3[%23] : memref<96xf32, #tpu.memory_space<smem>>
    %c0_i32_6 = arith.constant 0 : i32
    %25 = arith.addi %0, %c0_i32_6 : i32
    %c2_i32 = arith.constant 2 : i32
    %26 = arith.addi %25, %c2_i32 : i32
    %27 = arith.index_cast %26 : i32 to index
    %28 = memref.load %arg3[%27] : memref<96xf32, #tpu.memory_space<smem>>
    %c9_i32 = arith.constant 9 : i32
    %29 = arith.addi %0, %c9_i32 : i32
    %c0_i32_7 = arith.constant 0 : i32
    %30 = arith.addi %29, %c0_i32_7 : i32
    %31 = arith.index_cast %30 : i32 to index
    %32 = memref.load %arg3[%31] : memref<96xf32, #tpu.memory_space<smem>>
    %33 = vector.broadcast %13 : f32 to vector<1x512xf32>
    %34 = arith.mulf %33, %2 : vector<1x512xf32>
    %35 = vector.broadcast %14 : f32 to vector<1x512xf32>
    %36 = arith.mulf %35, %3 : vector<1x512xf32>
    %37 = arith.addf %34, %36 : vector<1x512xf32>
    %38 = vector.broadcast %15 : f32 to vector<1x512xf32>
    %39 = arith.mulf %38, %4 : vector<1x512xf32>
    %40 = arith.addf %37, %39 : vector<1x512xf32>
    %41 = vector.broadcast %16 : f32 to vector<1x512xf32>
    %42 = arith.addf %40, %41 : vector<1x512xf32>
    %43 = vector.broadcast %20 : f32 to vector<1x512xf32>
    %44 = arith.mulf %43, %2 : vector<1x512xf32>
    %45 = vector.broadcast %24 : f32 to vector<1x512xf32>
    %46 = arith.mulf %45, %3 : vector<1x512xf32>
    %47 = arith.addf %44, %46 : vector<1x512xf32>
    %48 = vector.broadcast %28 : f32 to vector<1x512xf32>
    %49 = arith.mulf %48, %4 : vector<1x512xf32>
    %50 = arith.addf %47, %49 : vector<1x512xf32>
    %51 = vector.broadcast %32 : f32 to vector<1x512xf32>
    %52 = arith.addf %50, %51 : vector<1x512xf32>
    %53 = arith.select %12, %52, %42 : vector<1x512xi1>, vector<1x512xf32>
    %c0_8 = arith.constant 0 : index
    %c0_9 = arith.constant 0 : index
    %c0_10 = arith.constant 0 : index
    %54 = vector.load %arg5[%c0_8, %c0_9, %c0_10] : memref<1x3x512xf32, #tpu.memory_space<vmem>>, vector<1x1x512xf32>
    %55 = vector.shape_cast %54 : vector<1x1x512xf32> to vector<1x512xf32>
    %56 = vector.shape_cast %53 : vector<1x512xf32> to vector<1x1x512xf32>
    tpu.vector_store %arg5[%c0_8, %c0_9, %c0_10], %56 {strides = array<i32>} : memref<1x3x512xf32, #tpu.memory_space<vmem>>, vector<1x1x512xf32>,
    %c3 = arith.constant 3 : index
    %57 = memref.load %arg2[%c3] : memref<12xf32, #tpu.memory_space<smem>>
    %c4 = arith.constant 4 : index
    %58 = memref.load %arg2[%c4] : memref<12xf32, #tpu.memory_space<smem>>
    %c5 = arith.constant 5 : index
    %59 = memref.load %arg2[%c5] : memref<12xf32, #tpu.memory_space<smem>>
    %c10 = arith.constant 10 : index
    %60 = memref.load %arg2[%c10] : memref<12xf32, #tpu.memory_space<smem>>
    %c3_i32 = arith.constant 3 : i32
    %61 = arith.addi %0, %c3_i32 : i32
    %c0_i32_11 = arith.constant 0 : i32
    %62 = arith.addi %61, %c0_i32_11 : i32
    %63 = arith.index_cast %62 : i32 to index
    %64 = memref.load %arg3[%63] : memref<96xf32, #tpu.memory_space<smem>>
    %c3_i32_12 = arith.constant 3 : i32
    %65 = arith.addi %0, %c3_i32_12 : i32
    %c1_i32_13 = arith.constant 1 : i32
    %66 = arith.addi %65, %c1_i32_13 : i32
    %67 = arith.index_cast %66 : i32 to index
    %68 = memref.load %arg3[%67] : memref<96xf32, #tpu.memory_space<smem>>
    %c3_i32_14 = arith.constant 3 : i32
    %69 = arith.addi %0, %c3_i32_14 : i32
    %c2_i32_15 = arith.constant 2 : i32
    %70 = arith.addi %69, %c2_i32_15 : i32
    %71 = arith.index_cast %70 : i32 to index
    %72 = memref.load %arg3[%71] : memref<96xf32, #tpu.memory_space<smem>>
    %c9_i32_16 = arith.constant 9 : i32
    %73 = arith.addi %0, %c9_i32_16 : i32
    %c1_i32_17 = arith.constant 1 : i32
    %74 = arith.addi %73, %c1_i32_17 : i32
    %75 = arith.index_cast %74 : i32 to index
    %76 = memref.load %arg3[%75] : memref<96xf32, #tpu.memory_space<smem>>
    %77 = vector.broadcast %57 : f32 to vector<1x512xf32>
    %78 = arith.mulf %77, %2 : vector<1x512xf32>
    %79 = vector.broadcast %58 : f32 to vector<1x512xf32>
    %80 = arith.mulf %79, %3 : vector<1x512xf32>
    %81 = arith.addf %78, %80 : vector<1x512xf32>
    %82 = vector.broadcast %59 : f32 to vector<1x512xf32>
    %83 = arith.mulf %82, %4 : vector<1x512xf32>
    %84 = arith.addf %81, %83 : vector<1x512xf32>
    %85 = vector.broadcast %60 : f32 to vector<1x512xf32>
    %86 = arith.addf %84, %85 : vector<1x512xf32>
    %87 = vector.broadcast %64 : f32 to vector<1x512xf32>
    %88 = arith.mulf %87, %2 : vector<1x512xf32>
    %89 = vector.broadcast %68 : f32 to vector<1x512xf32>
    %90 = arith.mulf %89, %3 : vector<1x512xf32>
    %91 = arith.addf %88, %90 : vector<1x512xf32>
    %92 = vector.broadcast %72 : f32 to vector<1x512xf32>
    %93 = arith.mulf %92, %4 : vector<1x512xf32>
    %94 = arith.addf %91, %93 : vector<1x512xf32>
    %95 = vector.broadcast %76 : f32 to vector<1x512xf32>
    %96 = arith.addf %94, %95 : vector<1x512xf32>
    %97 = arith.select %12, %96, %86 : vector<1x512xi1>, vector<1x512xf32>
    %c0_18 = arith.constant 0 : index
    %c1_19 = arith.constant 1 : index
    %c0_20 = arith.constant 0 : index
    %98 = vector.load %arg5[%c0_18, %c1_19, %c0_20] : memref<1x3x512xf32, #tpu.memory_space<vmem>>, vector<1x1x512xf32>
    %99 = vector.shape_cast %98 : vector<1x1x512xf32> to vector<1x512xf32>
    %100 = vector.shape_cast %97 : vector<1x512xf32> to vector<1x1x512xf32>
    tpu.vector_store %arg5[%c0_18, %c1_19, %c0_20], %100 {strides = array<i32>} : memref<1x3x512xf32, #tpu.memory_space<vmem>>, vector<1x1x512xf32>,
    %c6 = arith.constant 6 : index
    %101 = memref.load %arg2[%c6] : memref<12xf32, #tpu.memory_space<smem>>
    %c7 = arith.constant 7 : index
    %102 = memref.load %arg2[%c7] : memref<12xf32, #tpu.memory_space<smem>>
    %c8 = arith.constant 8 : index
    %103 = memref.load %arg2[%c8] : memref<12xf32, #tpu.memory_space<smem>>
    %c11 = arith.constant 11 : index
    %104 = memref.load %arg2[%c11] : memref<12xf32, #tpu.memory_space<smem>>
    %c6_i32 = arith.constant 6 : i32
    %105 = arith.addi %0, %c6_i32 : i32
    %c0_i32_21 = arith.constant 0 : i32
    %106 = arith.addi %105, %c0_i32_21 : i32
    %107 = arith.index_cast %106 : i32 to index
    %108 = memref.load %arg3[%107] : memref<96xf32, #tpu.memory_space<smem>>
    %c6_i32_22 = arith.constant 6 : i32
    %109 = arith.addi %0, %c6_i32_22 : i32
    %c1_i32_23 = arith.constant 1 : i32
    %110 = arith.addi %109, %c1_i32_23 : i32
    %111 = arith.index_cast %110 : i32 to index
    %112 = memref.load %arg3[%111] : memref<96xf32, #tpu.memory_space<smem>>
    %c6_i32_24 = arith.constant 6 : i32
    %113 = arith.addi %0, %c6_i32_24 : i32
    %c2_i32_25 = arith.constant 2 : i32
    %114 = arith.addi %113, %c2_i32_25 : i32
    %115 = arith.index_cast %114 : i32 to index
    %116 = memref.load %arg3[%115] : memref<96xf32, #tpu.memory_space<smem>>
    %c9_i32_26 = arith.constant 9 : i32
    %117 = arith.addi %0, %c9_i32_26 : i32
    %c2_i32_27 = arith.constant 2 : i32
    %118 = arith.addi %117, %c2_i32_27 : i32
    %119 = arith.index_cast %118 : i32 to index
    %120 = memref.load %arg3[%119] : memref<96xf32, #tpu.memory_space<smem>>
    %121 = vector.broadcast %101 : f32 to vector<1x512xf32>
    %122 = arith.mulf %121, %2 : vector<1x512xf32>
    %123 = vector.broadcast %102 : f32 to vector<1x512xf32>
    %124 = arith.mulf %123, %3 : vector<1x512xf32>
    %125 = arith.addf %122, %124 : vector<1x512xf32>
    %126 = vector.broadcast %103 : f32 to vector<1x512xf32>
    %127 = arith.mulf %126, %4 : vector<1x512xf32>
    %128 = arith.addf %125, %127 : vector<1x512xf32>
    %129 = vector.broadcast %104 : f32 to vector<1x512xf32>
    %130 = arith.addf %128, %129 : vector<1x512xf32>
    %131 = vector.broadcast %108 : f32 to vector<1x512xf32>
    %132 = arith.mulf %131, %2 : vector<1x512xf32>
    %133 = vector.broadcast %112 : f32 to vector<1x512xf32>
    %134 = arith.mulf %133, %3 : vector<1x512xf32>
    %135 = arith.addf %132, %134 : vector<1x512xf32>
    %136 = vector.broadcast %116 : f32 to vector<1x512xf32>
    %137 = arith.mulf %136, %4 : vector<1x512xf32>
    %138 = arith.addf %135, %137 : vector<1x512xf32>
    %139 = vector.broadcast %120 : f32 to vector<1x512xf32>
    %140 = arith.addf %138, %139 : vector<1x512xf32>
    %141 = arith.select %12, %140, %130 : vector<1x512xi1>, vector<1x512xf32>
    %c0_28 = arith.constant 0 : index
    %c2_29 = arith.constant 2 : index
    %c0_30 = arith.constant 0 : index
    %142 = vector.load %arg5[%c0_28, %c2_29, %c0_30] : memref<1x3x512xf32, #tpu.memory_space<vmem>>, vector<1x1x512xf32>
    %143 = vector.shape_cast %142 : vector<1x1x512xf32> to vector<1x512xf32>
    %144 = vector.shape_cast %141 : vector<1x512xf32> to vector<1x1x512xf32>
    tpu.vector_store %arg5[%c0_28, %c2_29, %c0_30], %144 {strides = array<i32>} : memref<1x3x512xf32, #tpu.memory_space<vmem>>, vector<1x1x512xf32>,
    return
  }
  func.func @transform_0(%arg0: i32) -> i32 {
    %c0_i32 = arith.constant 0 : i32
    %c0_i32_0 = arith.constant 0 : i32
    return %c0_i32 : i32
  }
  func.func @transform_1(%arg0: i32) -> i32 {
    %c0_i32 = arith.constant 0 : i32
    %c0_i32_0 = arith.constant 0 : i32
    return %c0_i32 : i32
  }
  func.func @transform_2(%arg0: i32) -> i32 {
    %c0_i32 = arith.constant 0 : i32
    %c0_i32_0 = arith.constant 0 : i32
    return %c0_i32 : i32
  }
  func.func @transform_3(%arg0: i32) -> (i32, i32) {
    %c0_i32 = arith.constant 0 : i32
    %c0_i32_0 = arith.constant 0 : i32
    %c0_i32_1 = arith.constant 0 : i32
    return %c0_i32, %c0_i32_0 : i32, i32
  }
  func.func @transform_4(%arg0: i32) -> (i32, i32, i32) {
    %c0_i32 = arith.constant 0 : i32
    %c0_i32_0 = arith.constant 0 : i32
    %c0_i32_1 = arith.constant 0 : i32
    return %arg0, %c0_i32, %c0_i32_0 : i32, i32, i32
  }
}

</mosaic_0001>

<bundles_post_ra>
// kernel: tpu_custom_call.1
= control target key start
LH: loop header
LB: loop body
LE: loop exit
PB: predicated region body
PF: predicated region fallthrough
CT: control target
= control target key end

     0   :  { %9 = vsyncpa [#allocation4], 0  ;;  %s1400_s0 = inlined_call_operand.hbm [shape: s32[2], index: 0, kind: input, shape index: {}]   ;;  %s1401_s1 = inlined_call_operand.vmem [shape: f32[12], index: 1, kind: input, shape index: {}]   ;;  %s1402_s2 = inlined_call_operand.vmem [shape: f32[96], index: 2, kind: input, shape index: {}]   ;;  %s1403_s3 = inlined_call_operand.hbm [shape: f32[3,512], index: 3, kind: input, shape index: {}]   ;;  %s1404_s4 = inlined_call_operand.vmem [shape: f32[8,3,512], index: 4, kind: output, shape index: {}]  }
   0x1   :  { %10 = vsyncpa [#allocation5], 0 }
   0x2   :  { %11 = vsyncpa [#allocation8], 0 }
   0x3   :  { %12 = vsyncpa [#allocation3], 0  ;;  %s1035_s15 = smov 0  }
   0x4 LB: > { %s155_s18 = sshll.u32 %s1401_s1, 4  ;;  %s1044_s19 = sadd.s32 4294967295, %s1003_s15   ;;  %s1003_s15 = sphi %s1035_s15, %s18_s15   ;;  %s156_s18 = int_to_ptr.vmem [resolvable:$true] %s155_s18 }
   0x5   : > { %p811_p0 = scmp.ge.s32.totalorder %s1003_s15, 1  ;;  %p133_p1 = scmp.lt.s32.totalorder %s1003_s15, 9 }
   0x6   : > { %p1405_p3 = scmp.eq.s32.totalorder %s1044_s19, 0  ;;  %s166_s23 = sshll.u32 %s1402_s2, 4  ;;  %s167_s23 = int_to_ptr.vmem [resolvable:$true] %s166_s23 }
   0x7   : > { %p1048_p2 = pnand %p811_p0, %p133_p1  ;;  %s1005_s25 = smov [#allocation9]  }
   0x8   : > { %s177_s26 = sshll.u32 %s1005_s25, 4  ;;  %s1006_s27 = smov [#allocation2]   ;;  %s1064_s26 = int_to_ptr.vmem [resolvable:$true] %s177_s26 }
   0x9   : > { %s1407_s20 = scalar_select %p1048_p2, 1, 0 }
   0xa   : > { %p880_p4 = pneg %p1048_p2  ;;  %s925_s30 = scalar_lea.vmem %s156_s18, 16 }
   0xb   : > { %p926_p6 = scmp.ne.s32.totalorder %s156_s18, %s925_s30  ;;  %p933_p10 = scmp.lt.s32.totalorder %s156_s18, %s156_s18 }
   0xc   : > { %p1060_p5 = pnand %p1405_p3, %p880_p4  ;;  %p934_p11 = scmp.lt.s32.totalorder %s925_s30, %s925_s30 }
   0xe   : > { %883 = dma.hbm_to_smem (!%p1060_p5), %s1400_s0, 16, %s1006_s27, [#allocation4]  }
   0xf   : > { %p927_p7 = pneg %p1060_p5  ;;  %p935_p12 = por %p934_p11, %p933_p10 }
  0x11   : > { %p928_p8 = pnand %p927_p7, %p926_p6 }
  0x13   : > { %p929_p9 = pneg %p928_p8 }
  0x15   : > { %p936_p13 = pnand %p935_p12, %p929_p9 }
  0x17   : > { %939 = shalt.err (!%p936_p13)
}
  0x18   : > { %s1007_s5 = smov [#allocation6]   ;;  %s940_s6 = scalar_lea.vmem %s167_s23, 16 }
  0x19   : > { %886 = dma.vmem_to_smem (!%p1060_p5), %s156_s18, 16, %s1007_s5, [#allocation5]  }
  0x1a   : > { %p941_p0 = scmp.ne.s32.totalorder %s167_s23, %s940_s6  ;;  %p948_p3 = scmp.lt.s32.totalorder %s167_s23, %s167_s23 }
  0x1b   : > { %p949_p2 = scmp.lt.s32.totalorder %s940_s6, %s940_s6 }
  0x1c   : > { %p943_p1 = pnand %p941_p0, %p927_p7 }
  0x1d   : > { %p950_p6 = por %p949_p2, %p948_p3 }
  0x1e   : > { %p944_p4 = pneg %p943_p1 }
  0x20   : > { %p951_p8 = pnand %p950_p6, %p944_p4 }
  0x22   : > { %954 = shalt.err (!%p951_p8)
}
  0x23   : > { %s1008_s7 = smov [#allocation7]   ;;  %s966_s8 = scalar_lea.vmem %s1064_s26, 256 }
  0x24   : > { %889 = dma.vmem_to_smem (!%p1060_p5), %s167_s23, 16, %s1008_s7, [#allocation8]  }
  0x25   : > { %p967_p9 = scmp.ne.s32.totalorder %s1064_s26, %s966_s8  ;;  %p974_p12 = scmp.lt.s32.totalorder %s1064_s26, %s1064_s26 }
  0x26   : > { %p975_p13 = scmp.lt.s32.totalorder %s966_s8, %s966_s8 }
  0x27   : > { %p969_p10 = pnand %p967_p9, %p927_p7 }
  0x28   : > { %p976_p2 = por %p975_p13, %p974_p12 }
  0x29   : > { %p970_p11 = pneg %p969_p10 }
  0x2b   : > { %p977_p3 = pnand %p976_p2, %p970_p11 }
  0x2d   : > { %980 = shalt.err (!%p977_p3)
}
  0x2e   : > { %892 = dma.hbm_to_vmem [thread:$0]  (!%p1060_p5), %s1403_s3, 256, %s1064_s26, [#allocation3]  }
  0x2f   : > { %p1409_p0 = scmp.ne.s32.totalorder %s1407_s20, 0 }
  0x30   : > { %p1410_p1 = scmp.eq.s32.totalorder (!%p1409_p0), %s1044_s19, 0 }
  0x31   : > { %190 = sbr.rel (%p1409_p0) target bundleno = 133 (0x85), region = 36 }
  0x36   : > { %986 = dma.done.wait (%p1410_p1), [#allocation4], 16   ;;  %p1411_p7 = pmov %p1410_p1 }
  0x37   : > { %p1412_p4 = pmov %p1410_p1 }
  0x38   : > { %988 = vsyncadd (%p1411_p7), [#allocation4], 4294967280 }
  0x39   : > { %990 = dma.done.wait (%p1412_p4), [#allocation5], 16   ;;  %p1413_p6 = pmov %p1410_p1 }
  0x3a   : > { %p1414_p8 = pmov %p1410_p1 }
  0x3b   : > { %992 = vsyncadd (%p1413_p6), [#allocation5], 4294967280 }
  0x3c   : > { %994 = dma.done.wait (%p1414_p8), [#allocation8], 16   ;;  %p1415_p5 = pmov %p1410_p1 }
  0x3d   : > { %p1416_p9 = pmov %p1410_p1 }
  0x3e   : > { %996 = vsyncadd (%p1415_p5), [#allocation8], 4294967280 }
  0x3f   : > { %998 = dma.done.wait (%p1416_p9), [#allocation3], 256   ;;  %p1417_p10 = pmov %p1410_p1 }
  0x41   : > { %1000 = vsyncadd (%p1417_p10), [#allocation3], 4294967040 }
  0x42   : > { %208 = sfence }
  0x43   : > { %v232_v0 = vlaneseq  ;;  %s237_s11 = sld [smem:[#allocation2]]  ;;  %s1115_s12 = smul.u32 12, %s1044_s19  ;;  %v1009_v1 = vmov 1966171168   ;;  %v1131_v6 = vld [vmem:[#allocation9] sm:$0x77] }
  0x44   : > { %s823_s13 = sld [smem:[#allocation2 + $0x1]]  ;;  %v383_v2 = vunpack.c.l.s4 %v1009_v1  ;;  %v1133_v7 = vld [vmem:[#allocation9 + $0x8] sm:$0x77]  ;;  %p224_p11 = scmp.lt.s32.totalorder %s1044_s19, 7 }
  0x45   : > { %s253_s14 = sld [smem:[#allocation6]]  ;;  %v1118_v3 = vand.u32 127, %v232_v0  ;;  %s258_s18 = sadd.s32 1, %s1115_s12  ;;  %v331_v4 = vshrl.u32 %v232_v0, 7  ;;  %vm1308_vm12 = vcmp.lt.s32.totalorder %v232_v0, 512 }
  0x46   : > { %s824_s16 = sld [smem:[#allocation6 + $0x1]]  ;;  %s260_s21 = sadd.s32 2, %s1115_s12  ;;  %v384_v5 = vunpack.c.0.s8 %v383_v2 }
  0x47   : > { %s1120_s17 = sld [smem:[#allocation6 + $0x2]]  ;;  %s262_s23 = sadd.s32 9, %s1115_s12  ;;  %v1136_v8 = vadd.s32 128, %v1118_v3  ;;  %v1143_v10 = vadd.s32 256, %v1118_v3  ;;  %v1146_v11 = vadd.s32 384, %v1118_v3  ;;  %v1152_v13 = vsub.s32 0, %v331_v4 }
  0x48   : > { %s1124_s20 = sld [smem:[#allocation6 + $0x9]]  ;;  %v1156_v16 = vsub.s32 4, %v331_v4  ;;  %v1158_v17 = vsub.s32 %v384_v5, %v331_v4  ;;  %s414_s29 = sadd.s32 3, %s1115_s12 }
  0x49   : > { %s1128_s22 = sld [smem:[#allocation7 + %s1115_s12]]  ;;  %v1138_v9 = vstv %s237_s11  ;;  %s416_s5 = sadd.s32 4, %s1115_s12 }
  0x4a   : > { %s1140_s24 = sld [smem:[#allocation7 + %s258_s18]]  ;;  %v1148_v12 = vstv %s823_s13  ;;  %vm239_vm0 = vcmp.ge.s32.totalorder %v1118_v3, %v1138_v9  ;;  %vm240_vm1 = vcmp.ge.s32.totalorder %v1136_v8, %v1138_v9  ;;  %vm241_vm4 = vcmp.ge.s32.totalorder %v1143_v10, %v1138_v9  ;;  %s418_s9 = sadd.s32 5, %s1115_s12 }
  0x4b   : > { %s1150_s25 = sld [smem:[#allocation7 + %s260_s21]]  ;;  %v264_v14 = vstv %s253_s14  ;;  %vm245_vm2 = vcmp.lt.s32.totalorder %v1118_v3, %v1148_v12  ;;  %vm246_vm3 = vcmp.lt.s32.totalorder %v1136_v8, %v1148_v12  ;;  %vm247_vm5 = vcmp.lt.s32.totalorder %v1143_v10, %v1148_v12  ;;  %s420_s10 = sadd.s32 10, %s1115_s12 }
  0x4c   : > { %s1154_s26 = sld [smem:[#allocation7 + %s262_s23]]  ;;  %v267_v15 = vstv %s824_s16  ;;  %v265_v18 = vmul.f32 %v264_v14, %v1131_v6  ;;  %v266_v19 = vmul.f32 %v264_v14, %v1133_v7  ;;  %vm242_vm6 = vcmp.ge.s32.totalorder %v1146_v11, %v1138_v9  ;;  %vm1222_vm8 = vmand %vm239_vm0, %vm245_vm2  ;;  %s1429_s19 = smov (!%p224_p11, %s1044_s19), 7 }
  0x4d   : > { %v268_v20 = vmul.f32 %v267_v15, %v1131_v6  ;;  %v269_v21 = vmul.f32 %v267_v15, %v1133_v7  ;;  %s1166_s27 = sld [smem:[#allocation6 + $0x3]]  ;;  %v280_v22 = vstv %s1120_s17  ;;  %vm248_vm7 = vcmp.lt.s32.totalorder %v1146_v11, %v1148_v12  ;;  %vm1240_vm9 = vmand %vm240_vm1, %vm246_vm3  ;;  %s569_s18 = sadd.s32 6, %s1115_s12 }
  0x4e   : > { %s1175_s28 = sld [smem:[#allocation6 + $0x4]]  ;;  %v281_v25 = vmul.f32 %v280_v22, %v1131_v6  ;;  %v282_v26 = vmul.f32 %v280_v22, %v1133_v7  ;;  %v293_v27 = vstv %s1124_s20  ;;  %vm1254_vm10 = vmand %vm241_vm4, %vm247_vm5  ;;  %s863_s20 = sshll.u32 %s1429_s19, 4 }
  0x4f   : > { %v827_v23 = vrot.slane %v268_v20, 9  ;;  %v828_v24 = vrot.slane %v269_v21, 9  ;;  %v296_v28 = vstv %s1128_s22  ;;  %s1191_s30 = sld [smem:[#allocation6 + $0x5]]  ;;  %vm1268_vm11 = vmand %vm242_vm6, %vm248_vm7  ;;  %s571_s19 = sadd.s32 7, %s1115_s12 }
  0x50   : > { %v299_v29 = vstv %s1140_s24  ;;  %v829_v32 = vrot.slane %v281_v25, 10  ;;  %v830_v33 = vrot.slane %v282_v26, 10  ;;  %s1194_s6 = sld [smem:[#allocation6 + $0xa]]  ;;  %v297_v34 = vmul.f32 %v296_v28, %v1131_v6 }
  0x51   : > { %v278_v30 = vadd.f32 %v827_v23, %v265_v18  ;;  %v279_v31 = vadd.f32 %v828_v24, %v266_v19  ;;  %v298_v35 = vmul.f32 %v296_v28, %v1133_v7  ;;  %v300_v36 = vmul.f32 %v299_v29, %v1131_v6  ;;  %s1200_s7 = sld [smem:[#allocation7 + %s414_s29]]  ;;  %s575_s29 = sadd.s32 11, %s1115_s12 }
  0x52   : > { %v301_v37 = vmul.f32 %v299_v29, %v1133_v7  ;;  %v312_v40 = vstv %s1150_s25  ;;  %v325_v41 = vstv %s1154_s26  ;;  %s1204_s8 = sld [smem:[#allocation7 + %s416_s5]]  ;;  %s1316_s25 = scalar_lea.vmem %s1404_s4, %s863_s20 }
  0x53   : > { %v291_v38 = vadd.f32 %v829_v32, %v278_v30  ;;  %v292_v39 = vadd.f32 %v830_v33, %v279_v31  ;;  %v831_v42 = vrot.slane %v300_v36, 9  ;;  %v313_v44 = vmul.f32 %v312_v40, %v1131_v6  ;;  %s1258_s11 = sld [smem:[#allocation7 + %s418_s9]] }
  0x54   : > { %v832_v43 = vrot.slane %v301_v37, 9  ;;  %v314_v45 = vmul.f32 %v312_v40, %v1133_v7  ;;  %v422_v48 = vstv %s1166_s27  ;;  %v425_v49 = vstv %s1175_s28  ;;  %s1272_s13 = sld [smem:[#allocation7 + %s420_s10]]  ;;  %s573_s27 = sadd.s32 8, %s1115_s12 }
  0x55   : > { %v294_v46 = vadd.f32 %v293_v27, %v291_v38  ;;  %v295_v47 = vadd.f32 %v293_v27, %v292_v39  ;;  %v310_v50 = vadd.f32 %v831_v42, %v297_v34  ;;  %v833_v52 = vrot.slane %v313_v44, 10  ;;  %s1280_s14 = sld [smem:[#allocation6 + $0x6]] }
  0x56   : > { %v311_v51 = vadd.f32 %v832_v43, %v298_v35  ;;  %v834_v53 = vrot.slane %v314_v45, 10  ;;  %v423_v61 = vmul.f32 %v422_v48, %v1131_v6  ;;  %v424_v62 = vmul.f32 %v422_v48, %v1133_v7  ;;  %s1282_s16 = sld [smem:[#allocation6 + $0x7]] }
  0x57   : > { %v355_v54 = vrot.slane %v294_v46, %v1152_v13  ;;  %v359_v55 = vrot.slane %v294_v46, %v1156_v16  ;;  %v363_v56 = vrot.slane %v295_v47, %v1152_v13  ;;  %v367_v57 = vrot.slane %v295_v47, %v1156_v16  ;;  %s1292_s17 = sld [smem:[#allocation6 + $0x8]] }
  0x58   : > { %v323_v59 = vadd.f32 %v833_v52, %v310_v50  ;;  %v324_v60 = vadd.f32 %v834_v53, %v311_v51  ;;  %v426_v1 = vmul.f32 %v425_v49, %v1131_v6  ;;  %v427_v2 = vmul.f32 %v425_v49, %v1133_v7  ;;  %s1300_s21 = sld [smem:[#allocation6 + $0xb]] }
  0x59   : > { %v438_v3 = vstv %s1191_s30  ;;  %v451_v4 = vstv %s1194_s6  ;;  %v454_v21 = vstv %s1200_s7  ;;  %v457_v22 = vstv %s1204_s8  ;;  %s1304_s22 = sld [smem:[#allocation7 + %s569_s18]] }
  0x5a   : > { %v326_v8 = vadd.f32 %v325_v41, %v323_v59  ;;  %v327_v14 = vadd.f32 %v325_v41, %v324_v60  ;;  %v439_v15 = vmul.f32 %v438_v3, %v1131_v6  ;;  %v440_v18 = vmul.f32 %v438_v3, %v1133_v7  ;;  %s1323_s26 = sld [smem:[#allocation7 + %s571_s19]] }
  0x5b   : > { %v839_v19 = vrot.slane %v426_v1, 9  ;;  %v840_v20 = vrot.slane %v427_v2, 9  ;;  %v455_v36 = vmul.f32 %v454_v21, %v1131_v6  ;;  %v456_v37 = vmul.f32 %v454_v21, %v1133_v7  ;;  %s1335_s28 = sld [smem:[#allocation7 + %s573_s27]] }
  0x5c   : > { %v333_v23 = vrot.slane %v326_v8, %v1152_v13  ;;  %v337_v24 = vrot.slane %v326_v8, %v1156_v16  ;;  %v341_v12 = vrot.slane %v327_v14, %v1152_v13  ;;  %v345_v25 = vrot.slane %v327_v14, %v1156_v16  ;;  %s1350_s30 = sld [smem:[#allocation7 + %s575_s29]] }
  0x5d   : > { %v436_v9 = vadd.f32 %v839_v19, %v423_v61  ;;  %v437_v11 = vadd.f32 %v840_v20, %v424_v62  ;;  %v841_v26 = vrot.slane %v439_v15, 10  ;;  %v842_v27 = vrot.slane %v440_v18, 10 }
  0x5e   : > { %v372_v28 = vsel %vm1222_vm8, %v333_v23, %v355_v54  ;;  %v373_v29 = vsel %vm1240_vm9, %v337_v24, %v359_v55  ;;  %v374_v30 = vsel %vm1254_vm10, %v341_v12, %v363_v56  ;;  %v375_v31 = vsel %vm1268_vm11, %v345_v25, %v367_v57 }
  0x5f   : > { %v380_v32 = vcombine.low %v372_v28, %v373_v29  ;;  %v381_v33 = vcombine.low %v374_v30, %v375_v31  ;;  %v449_v34 = vadd.f32 %v841_v26, %v436_v9  ;;  %v450_v35 = vadd.f32 %v842_v27, %v437_v11 }
  0x60   : > { %v458_v38 = vmul.f32 %v457_v22, %v1131_v6  ;;  %v459_v39 = vmul.f32 %v457_v22, %v1133_v7  ;;  %v470_v47 = vstv %s1258_s11  ;;  %v483_v0 = vstv %s1272_s13 }
  0x61   : > { %v388_v40 = vrot.slane %v380_v32, %v1158_v17  ;;  %v395_v41 = vrot.slane %v381_v33, %v1158_v17  ;;  %v452_v42 = vadd.f32 %v451_v4, %v449_v34  ;;  %v453_v43 = vadd.f32 %v451_v4, %v450_v35 }
  0x62   : > { %v843_v45 = vrot.slane %v458_v38, 9  ;;  %v844_v46 = vrot.slane %v459_v39, 9  ;;  %v471_v49 = vmul.f32 %v470_v47, %v1131_v6  ;;  %v472_v50 = vmul.f32 %v470_v47, %v1133_v7 }
  0x63   : > { %v396_v48 = vcombine.low %v388_v40, %v395_v41  ;;  %v513_v53 = vrot.slane %v452_v42, %v1152_v13  ;;  %v517_v54 = vrot.slane %v452_v42, %v1156_v16  ;;  %v521_v59 = vrot.slane %v453_v43, %v1152_v13 }
  0x64   : > { %v468_v51 = vadd.f32 %v843_v45, %v455_v36  ;;  %v469_v52 = vadd.f32 %v844_v46, %v456_v37  ;;  %v845_v56 = vrot.slane %v471_v49, 10  ;;  %v846_v57 = vrot.slane %v472_v50, 10 }
  0x65   : > { %v403_v55 = vrot.slane %v396_v48, %v1158_v17  ;;  %v525_v60 = vrot.slane %v453_v43, %v1156_v16  ;;  %v577_v61 = vstv %s1280_s14  ;;  %v580_v62 = vstv %s1282_s16 }
  0x66   : > { %v593_v1 = vstv %s1292_s17  ;;  %v481_v2 = vadd.f32 %v845_v56, %v468_v51  ;;  %v482_v3 = vadd.f32 %v846_v57, %v469_v52  ;;  %v578_v4 = vmul.f32 %v577_v61, %v1131_v6 }
  0x67   : > { %409 = vst.msk [vmem:[%s1316_s25] ss:$4 sm:$0xf] %vm1308_vm12, %v403_v55  ;;  %v579_v8 = vmul.f32 %v577_v61, %v1133_v7  ;;  %v581_v14 = vmul.f32 %v580_v62, %v1131_v6  ;;  %v582_v15 = vmul.f32 %v580_v62, %v1133_v7  ;;  %v594_v18 = vmul.f32 %v593_v1, %v1131_v6 }
  0x68   : > { %v595_v19 = vmul.f32 %v593_v1, %v1133_v7  ;;  %v484_v20 = vadd.f32 %v483_v0, %v481_v2  ;;  %v485_v21 = vadd.f32 %v483_v0, %v482_v3  ;;  %v606_v22 = vstv %s1300_s21 }
  0x69   : > { %v609_v23 = vstv %s1304_s22  ;;  %v852_v24 = vrot.slane %v581_v14, 9  ;;  %v853_v12 = vrot.slane %v582_v15, 9  ;;  %v854_v25 = vrot.slane %v594_v18, 10 }
  0x6a   : > { %v855_v9 = vrot.slane %v595_v19, 10  ;;  %v491_v11 = vrot.slane %v484_v20, %v1152_v13  ;;  %v495_v26 = vrot.slane %v484_v20, %v1156_v16  ;;  %v499_v27 = vrot.slane %v485_v21, %v1152_v13 }
  0x6b   : > { %v503_v28 = vrot.slane %v485_v21, %v1156_v16  ;;  %v591_v29 = vadd.f32 %v852_v24, %v578_v4  ;;  %v592_v30 = vadd.f32 %v853_v12, %v579_v8  ;;  %v610_v31 = vmul.f32 %v609_v23, %v1131_v6 }
  0x6c   : > { %v612_v32 = vstv %s1323_s26  ;;  %v530_v33 = vsel %vm1222_vm8, %v491_v11, %v513_v53  ;;  %v531_v34 = vsel %vm1240_vm9, %v495_v26, %v517_v54  ;;  %v532_v35 = vsel %vm1254_vm10, %v499_v27, %v521_v59 }
  0x6d   : > { %v533_v36 = vsel %vm1268_vm11, %v503_v28, %v525_v60  ;;  %v538_v37 = vcombine.low %v530_v33, %v531_v34  ;;  %v604_v39 = vadd.f32 %v854_v25, %v591_v29  ;;  %v605_v40 = vadd.f32 %v855_v9, %v592_v30 }
  0x6e   : > { %v539_v38 = vcombine.low %v532_v35, %v533_v36  ;;  %v611_v41 = vmul.f32 %v609_v23, %v1133_v7  ;;  %v613_v42 = vmul.f32 %v612_v32, %v1131_v6  ;;  %v614_v43 = vmul.f32 %v612_v32, %v1133_v7 }
  0x6f   : > { %v625_v45 = vstv %s1335_s28  ;;  %v546_v46 = vrot.slane %v538_v37, %v1158_v17  ;;  %v607_v52 = vadd.f32 %v606_v22, %v604_v39  ;;  %v608_v53 = vadd.f32 %v606_v22, %v605_v40 }
  0x70   : > { %v553_v47 = vrot.slane %v539_v38, %v1158_v17  ;;  %v856_v48 = vrot.slane %v613_v42, 9  ;;  %v857_v49 = vrot.slane %v614_v43, 9  ;;  %v626_v50 = vmul.f32 %v625_v45, %v1131_v6 }
  0x71   : > { %v627_v0 = vmul.f32 %v625_v45, %v1133_v7  ;;  %v638_v60 = vstv %s1350_s30  ;;  %v668_v1 = vrot.slane %v607_v52, %v1152_v13  ;;  %v672_v6 = vrot.slane %v607_v52, %v1156_v16 }
  0x72   : > { %v554_v51 = vcombine.low %v546_v46, %v553_v47  ;;  %v623_v54 = vadd.f32 %v856_v48, %v610_v31  ;;  %v624_v55 = vadd.f32 %v857_v49, %v611_v41  ;;  %v858_v56 = vrot.slane %v626_v50, 10 }
  0x73   : > { %v859_v57 = vrot.slane %v627_v0, 10  ;;  %v676_v3 = vrot.slane %v608_v53, %v1152_v13  ;;  %v680_v4 = vrot.slane %v608_v53, %v1156_v16 }
  0x74   : > { %v561_v59 = vrot.slane %v554_v51, %v1158_v17  ;;  %v636_v61 = vadd.f32 %v858_v56, %v623_v54 }
  0x75   : > { %v637_v62 = vadd.f32 %v859_v57, %v624_v55 }
  0x76   : > { %847 = vst.msk [vmem:[%s1316_s25 + $0x1] ss:$4 sm:$0xf] %vm1308_vm12, %v561_v59  ;;  %v639_v7 = vadd.f32 %v638_v60, %v636_v61 }
  0x77   : > { %v640_v2 = vadd.f32 %v638_v60, %v637_v62 }
  0x78   : > { %v646_v8 = vrot.slane %v639_v7, %v1152_v13  ;;  %v650_v14 = vrot.slane %v639_v7, %v1156_v16 }
  0x79   : > { %v654_v15 = vrot.slane %v640_v2, %v1152_v13  ;;  %v658_v18 = vrot.slane %v640_v2, %v1156_v16 }
  0x7a   : > { %v685_v19 = vsel %vm1222_vm8, %v646_v8, %v668_v1  ;;  %v686_v20 = vsel %vm1240_vm9, %v650_v14, %v672_v6 }
  0x7b   : > { %v687_v21 = vsel %vm1254_vm10, %v654_v15, %v676_v3  ;;  %v688_v22 = vsel %vm1268_vm11, %v658_v18, %v680_v4  ;;  %v693_v23 = vcombine.low %v685_v19, %v686_v20 }
  0x7c   : > { %v694_v24 = vcombine.low %v687_v21, %v688_v22 }
  0x7d   : > { %v701_v12 = vrot.slane %v693_v23, %v1158_v17 }
  0x7e   : > { %v708_v13 = vrot.slane %v694_v24, %v1158_v17 }
  0x80   : > { %v709_v25 = vcombine.low %v701_v12, %v708_v13 }
  0x82   : > { %v716_v16 = vrot.slane %v709_v25, %v1158_v17 }
  0x84   : > { %860 = vst.msk [vmem:[%s1316_s25 + $0x2] ss:$4 sm:$0xf] %vm1308_vm12, %v716_v16 }
  0x85 PF: > { %s18_s15 = sadd.s32 1, %s1003_s15  }
  0x86   : > { %p15_p12 = scmp.ge.s32.totalorder %s18_s15, 10  }
  0x88   :  { %17 = sbr.rel (!%p15_p12) target bundleno = 4 (0x4), region = 84 }
  0x8d   :  { %741 = vsyncpa [#allocation3], 1 }
  0x8e   :  { %743 = vsyncpa [#allocation3 + $0x1], 1 }
  0x8f   :  { %744 = vsyncpa [#allocation4], 1 }
  0x90   :  { %746 = vsyncpa [#allocation4 + $0x1], 1 }
  0x91   :  { %747 = vsyncpa [#allocation5], 1 }
  0x92   :  { %749 = vsyncpa [#allocation5 + $0x1], 1 }
  0x93   :  { %750 = vsyncpa [#allocation8], 1 }

</bundles_post_ra>
